<compile_context>
chip_gen: v5e
topology: v5e:2x2
jax: 0.10.0
libtpu: 0.0.40
codegen_flags: <defaults>
</compile_context>

<pallas_src>
import functools

import jax
import jax.numpy as jnp
from jax import lax
from jax.experimental import pallas as pl
from jax.experimental.pallas import tpu as pltpu


def _round_up(x, m):
    return (x + m - 1) // m * m


def _pad2(a, rows, cols):
    return jnp.pad(a, ((0, rows - a.shape[0]), (0, cols - a.shape[1])))


def _device_kind():
    try:
        return jax.devices()[0].device_kind.lower()
    except Exception:
        return ""


def _vmem_cap_bytes():
    try:
        return int(pltpu.get_tpu_info().vmem_capacity_bytes)
    except Exception:
        return 64 << 20  # conservative fallback: v7x per-core VMEM


def _default_feature_pad(kind):
    # v6e / v7x MXUs are 2x256x256 -> pad feature dims to 256; v5e (and older) are 128-wide.
    if any(v in kind for v in ("v2", "v3", "v4", "v5")):
        return 128
    return 256


def _default_spill_threshold(kind):
    # bf16 h-spill vs recompute break-even on the padded dim_in (HBM/MXU roofline):
    #   v5e ~500, v7x ~650, v6e ~1400 (recompute wins below these).
    if "v5" in kind:
        return 512
    if "v7" in kind:
        return 640
    return 1408


def _stats_kernel(x_ref, w1_ref, *out_refs, spill_h):
    """h = x @ W1 (bias-free: BN cancels b1); emit per-tile column sum / sum-of-squares."""
    sum_ref, sumsq_ref = out_refs[0], out_refs[1]
    h = jnp.dot(x_ref[...], w1_ref[...], preferred_element_type=jnp.float32)
    if spill_h:
        hb = h.astype(jnp.bfloat16)
        out_refs[2][...] = hb
        h = hb.astype(jnp.float32)  # keep stats consistent with the spilled values
    # Zero-padded batch rows (and no b1) contribute exactly 0 -> no row mask needed.
    sum_ref[0] = jnp.sum(h, axis=0, keepdims=True)
    sumsq_ref[0] = jnp.sum(h * h, axis=0, keepdims=True)


def _apply_kernel(*refs, spill_h):
    """Fused BN(scale/shift) -> ReLU -> Linear(W2, b2) -> L2 normalize on one batch tile."""
    if spill_h:
        h_ref, scale_ref, shift_ref, w2_ref, b2_ref, o_ref = refs
        h = h_ref[...].astype(jnp.float32)
    else:
        x_ref, w1_ref, scale_ref, shift_ref, w2_ref, b2_ref, o_ref = refs
        h = jnp.dot(x_ref[...], w1_ref[...], preferred_element_type=jnp.float32)
    a = jnp.maximum(h * scale_ref[...] + shift_ref[...], 0.0)
    z = jnp.dot(a.astype(w2_ref.dtype), w2_ref[...],
                preferred_element_type=jnp.float32) + b2_ref[...]
    sq = jnp.sum(z * z, axis=-1, keepdims=True)
    o_ref[...] = (z * lax.rsqrt(jnp.maximum(sq, 1e-24))).astype(o_ref.dtype)


def projection_head(x, w1, b1, gamma, beta, w2, b2, *, tm=512, feature_pad=None,
                    spill_h=None):
    """x: [N, dim_in] f32 -> [N, proj_dim] f32 (weights stored as [in, out]).

    `b1` is accepted for interface parity with nn.Linear but is intentionally unused:
    a Linear bias followed by train-mode BatchNorm is cancelled exactly by the mean
    subtraction, so dropping it is mathematically equivalent and saves a broadcast add
    per tile in both kernels, one resident VMEM buffer, and one DMA.
    """
    del b1
    n, d = x.shape
    p = w2.shape[1]

    kind = _device_kind()
    if feature_pad is None:
        feature_pad = _default_feature_pad(kind)
    dp = _round_up(d, feature_pad)
    pp = _round_up(p, feature_pad)
    if spill_h is None:
        spill_h = dp >= _default_spill_threshold(kind)

    # Batch tile: sublane multiple, no larger than the (padded) batch, shrunk to fit VMEM.
    tm = _round_up(max(8, min(tm, _round_up(n, 8))), 8)
    cap = _vmem_cap_bytes()
    budget = max(cap - (8 << 20), 8 << 20)

    def stats_need(t):
        # resident W1 + double-buffered x tile (+ optional h-spill tile) + tiny partials
        return (dp * dp * 2 + 2 * t * dp * 2
                + (2 * t * dp * 2 if spill_h else 0) + 4 * dp * 4)

    def apply_need(t):
        resident = ((0 if spill_h else dp * dp * 2) + dp * pp * 2 + (2 * dp + pp) * 4)
        return resident + 2 * t * dp * 2 + 2 * t * pp * 4

    while max(stats_need(tm), apply_need(tm)) > budget and tm > 8:
        tm = max(8, (tm // 2) // 8 * 8)

    n_pad = _round_up(n, tm)
    nt = n_pad // tm

    # Pad (numerically exact for this op chain) and cast MXU operands to bf16.
    xb = _pad2(x, n_pad, dp).astype(jnp.bfloat16)
    w1b = _pad2(w1, dp, dp).astype(jnp.bfloat16)
    w2b = _pad2(w2, dp, pp).astype(jnp.bfloat16)
    gp = _pad2(gamma, 1, dp).astype(jnp.float32)
    bp = _pad2(beta, 1, dp).astype(jnp.float32)
    b2p = _pad2(b2, 1, pp).astype(jnp.float32)

    def resident(shape):
        # Constant-index operands: single-buffered (never change across the grid).
        return pl.BlockSpec(shape, lambda i: (0, 0), pipeline_mode=pl.Buffered(1))

    # ---- Kernel A: BN statistics (batch-tile axis is core-parallel) --------------------
    stats_out_shape = [jax.ShapeDtypeStruct((nt, 1, dp), jnp.float32),
                       jax.ShapeDtypeStruct((nt, 1, dp), jnp.float32)]
    stats_out_specs = [pl.BlockSpec((1, 1, dp), lambda i: (i, 0, 0)),
                       pl.BlockSpec((1, 1, dp), lambda i: (i, 0, 0))]
    if spill_h:
        stats_out_shape.append(jax.ShapeDtypeStruct((n_pad, dp), jnp.bfloat16))
        stats_out_specs.append(pl.BlockSpec((tm, dp), lambda i: (i, 0)))

    stats_flops = 2 * n_pad * dp * dp
    stats_bytes = (n_pad * dp * 2 + dp * dp * 2 + 2 * nt * dp * 4
                   + (n_pad * dp * 2 if spill_h else 0))

    stats_out = pl.pallas_call(
        functools.partial(_stats_kernel, spill_h=spill_h),
        out_shape=tuple(stats_out_shape),
        grid_spec=pltpu.PrefetchScalarGridSpec(
            num_scalar_prefetch=0,
            grid=(nt,),
            in_specs=[
                pl.BlockSpec((tm, dp), lambda i: (i, 0)),   # x: batch-tiled, double-buffered
                resident((dp, dp)),                          # W1: resident, single-buffered
            ],
            out_specs=stats_out_specs,
        ),
        compiler_params=pltpu.CompilerParams(
            dimension_semantics=("parallel",),
            vmem_limit_bytes=int(min(stats_need(tm) + (16 << 20), cap))),
        cost_estimate=pl.CostEstimate(flops=int(stats_flops), transcendentals=0,
                                      bytes_accessed=int(stats_bytes)),
    )(xb, w1b)

    if spill_h:
        part_sum, part_sumsq, h_spill = stats_out
    else:
        part_sum, part_sumsq = stats_out
        h_spill = None

    # ---- Tiny XLA combine: global mean/var -> single fused BN scale/shift --------------
    inv_n = 1.0 / float(n)
    col_sum = jnp.sum(part_sum[:, 0, :], axis=0, keepdims=True)      # (1, dp)
    col_sumsq = jnp.sum(part_sumsq[:, 0, :], axis=0, keepdims=True)  # (1, dp)
    mean = col_sum * inv_n
    var = jnp.maximum(col_sumsq * inv_n - mean * mean, 0.0)          # biased (train mode)
    scale = gp * lax.rsqrt(var + 1e-5)
    shift = bp - mean * scale

    # ---- Kernel B: apply BN + ReLU + second Linear + L2 normalize ----------------------
    apply_flops = (0 if spill_h else 2 * n_pad * dp * dp) + 2 * n_pad * dp * pp
    apply_bytes = (n_pad * dp * 2 + (0 if spill_h else dp * dp * 2) + dp * pp * 2
                   + (2 * dp + pp) * 4 + n_pad * pp * 4)

    if spill_h:
        apply_inputs = (h_spill, scale, shift, w2b, b2p)
        apply_in_specs = [pl.BlockSpec((tm, dp), lambda i: (i, 0)),   # h: batch-tiled
                          resident((1, dp)), resident((1, dp)),
                          resident((dp, pp)), resident((1, pp))]
    else:
        apply_inputs = (xb, w1b, scale, shift, w2b, b2p)
        apply_in_specs = [pl.BlockSpec((tm, dp), lambda i: (i, 0)),   # x: batch-tiled
                          resident((dp, dp)),
                          resident((1, dp)), resident((1, dp)),
                          resident((dp, pp)), resident((1, pp))]

    out = pl.pallas_call(
        functools.partial(_apply_kernel, spill_h=spill_h),
        out_shape=jax.ShapeDtypeStruct((n_pad, pp), jnp.float32),
        grid_spec=pltpu.PrefetchScalarGridSpec(
            num_scalar_prefetch=0,
            grid=(nt,),
            in_specs=apply_in_specs,
            out_specs=pl.BlockSpec((tm, pp), lambda i: (i, 0)),
        ),
        compiler_params=pltpu.CompilerParams(
            dimension_semantics=("parallel",),
            vmem_limit_bytes=int(min(apply_need(tm) + (16 << 20), cap))),
        cost_estimate=pl.CostEstimate(flops=int(apply_flops), transcendentals=int(n_pad),
                                      bytes_accessed=int(apply_bytes)),
    )(*apply_inputs)
    return out[:n, :p]


def init_params(key, dim_in, proj_dim):
    """Deterministic PyTorch-style Linear init (uniform(-1/sqrt(fan_in), 1/sqrt(fan_in)))."""
    k1, k2, k3, k4 = jax.random.split(key, 4)
    bound1 = 1.0 / jnp.sqrt(dim_in)
    # weights stored transposed: [in, out]
    w1 = jax.random.uniform(k1, (dim_in, dim_in), jnp.float32, -bound1, bound1)
    b1 = jax.random.uniform(k2, (1, dim_in), jnp.float32, -bound1, bound1)
    w2 = jax.random.uniform(k3, (dim_in, proj_dim), jnp.float32, -bound1, bound1)
    b2 = jax.random.uniform(k4, (1, proj_dim), jnp.float32, -bound1, bound1)
    gamma = jnp.ones((1, dim_in), jnp.float32)   # BatchNorm1d weight
    beta = jnp.zeros((1, dim_in), jnp.float32)   # BatchNorm1d bias
    return w1, b1, gamma, beta, w2, b2


def _reference(x, w1, b1, gamma, beta, w2, b2):
    h = x @ w1 + b1
    mean = h.mean(axis=0, keepdims=True)
    var = ((h - mean) ** 2).mean(axis=0, keepdims=True)
    h = gamma * (h - mean) / jnp.sqrt(var + 1e-5) + beta
    h = jnp.maximum(h, 0.0)
    z = h @ w2 + b2
    return z / jnp.maximum(jnp.linalg.norm(z, axis=-1, keepdims=True), 1e-12)


if __name__ == "__main__":
    # Small shapes; tm=8 forces multiple batch tiles, and N=20 exercises zero-padded rows.
    N, DIM_IN, PROJ_DIM = 20, 48, 24

    key = jax.random.PRNGKey(0)
    kx, kp = jax.random.split(key)
    x = jax.random.normal(kx, (N, DIM_IN), jnp.float32)
    params = init_params(kp, DIM_IN, PROJ_DIM)
    ref = _reference(x, *params)

    # Exercise both the recompute path and the bf16 h-spill path, then the auto defaults.
    for spill in (False, True):
        out = jax.block_until_ready(projection_head(x, *params, tm=8, spill_h=spill))
        assert out.shape == (N, PROJ_DIM)
        # bf16 MXU path => loosened tolerance vs the f32 reference.
        assert jnp.allclose(out, ref, atol=2e-2, rtol=2e-2), f"mismatch (spill_h={spill})"
        assert jnp.allclose(jnp.linalg.norm(out, axis=-1), 1.0, atol=1e-3), "not unit-norm"

    out = jax.block_until_ready(projection_head(x, *params))   # auto tm / padding / spill
    assert jnp.allclose(out, ref, atol=2e-2, rtol=2e-2), "mismatch (defaults)"

    print("KERNEL_OK")
</pallas_src>

<mosaic_0001>
module attributes {stable_mosaic.version = 11 : i64} {
  func.func @_stats_kernel(%arg0: i32, %arg1: memref<8x256xbf16, #tpu.memory_space<vmem>>, %arg2: memref<256x256xbf16, #tpu.memory_space<vmem>>, %arg3: memref<1x1x256xf32, #tpu.memory_space<vmem>>, %arg4: memref<1x1x256xf32, #tpu.memory_space<vmem>>) attributes {dimension_semantics = [#tpu.dimension_semantics<parallel>], iteration_bounds = array<i64: 3>, scalar_prefetch = 0 : i64, scratch_operands = 0 : i64, tpu.core_type = #tpu.core_type<tc>, window_params = [{transform_indices = @transform_0, window_bounds = array<i64: 8, 256>}, {pipeline_mode = #tpu.pipeline_mode<synchronous>, transform_indices = @transform_1, window_bounds = array<i64: 256, 256>}, {transform_indices = @transform_2, window_bounds = array<i64: 1, 1, 256>}, {transform_indices = @transform_3, window_bounds = array<i64: 1, 1, 256>}]} {
    %c0 = arith.constant 0 : index
    %c0_0 = arith.constant 0 : index
    %0 = vector.load %arg1[%c0, %c0_0] : memref<8x256xbf16, #tpu.memory_space<vmem>>, vector<8x256xbf16>
    %c0_1 = arith.constant 0 : index
    %c0_2 = arith.constant 0 : index
    %1 = vector.load %arg2[%c0_1, %c0_2] : memref<256x256xbf16, #tpu.memory_space<vmem>>, vector<256x256xbf16>
    %cst = arith.constant dense<0.000000e+00> : vector<8x256xf32>
    %2 = tpu.matmul %0, %1, %cst {dimension_numbers = #tpu.dot_dimension_numbers<[1], [0], [0], [1], [0, 0, 1, 1], [], []>} : vector<8x256xbf16>, vector<256x256xbf16>, vector<8x256xf32> -> vector<8x256xf32>
    %cst_3 = arith.constant dense<0.000000e+00> : vector<256xf32>
    %3 = vector.multi_reduction <add>, %2, %cst_3 [0] : vector<8x256xf32> to vector<256xf32>
    %4 = vector.shape_cast %3 : vector<256xf32> to vector<1x256xf32>
    %c0_4 = arith.constant 0 : index
    %c0_5 = arith.constant 0 : index
    %c0_6 = arith.constant 0 : index
    %5 = vector.load %arg3[%c0_4, %c0_5, %c0_6] : memref<1x1x256xf32, #tpu.memory_space<vmem>>, vector<1x1x256xf32>
    %6 = vector.shape_cast %5 : vector<1x1x256xf32> to vector<1x256xf32>
    %7 = vector.shape_cast %4 : vector<1x256xf32> to vector<1x1x256xf32>
    tpu.vector_store %arg3[%c0_4, %c0_5, %c0_6], %7 {strides = array<i32>} : memref<1x1x256xf32, #tpu.memory_space<vmem>>, vector<1x1x256xf32>,
    %8 = arith.mulf %2, %2 : vector<8x256xf32>
    %cst_7 = arith.constant dense<0.000000e+00> : vector<256xf32>
    %9 = vector.multi_reduction <add>, %8, %cst_7 [0] : vector<8x256xf32> to vector<256xf32>
    %10 = vector.shape_cast %9 : vector<256xf32> to vector<1x256xf32>
    %c0_8 = arith.constant 0 : index
    %c0_9 = arith.constant 0 : index
    %c0_10 = arith.constant 0 : index
    %11 = vector.load %arg4[%c0_8, %c0_9, %c0_10] : memref<1x1x256xf32, #tpu.memory_space<vmem>>, vector<1x1x256xf32>
    %12 = vector.shape_cast %11 : vector<1x1x256xf32> to vector<1x256xf32>
    %13 = vector.shape_cast %10 : vector<1x256xf32> to vector<1x1x256xf32>
    tpu.vector_store %arg4[%c0_8, %c0_9, %c0_10], %13 {strides = array<i32>} : memref<1x1x256xf32, #tpu.memory_space<vmem>>, vector<1x1x256xf32>,
    return
  }
  func.func @transform_0(%arg0: i32) -> (i32, i32) {
    %c0_i32 = arith.constant 0 : i32
    %c0_i32_0 = arith.constant 0 : i32
    return %arg0, %c0_i32 : i32, i32
  }
  func.func @transform_1(%arg0: i32) -> (i32, i32) {
    %c0_i32 = arith.constant 0 : i32
    %c0_i32_0 = arith.constant 0 : i32
    %c0_i32_1 = arith.constant 0 : i32
    return %c0_i32, %c0_i32_0 : i32, i32
  }
  func.func @transform_2(%arg0: i32) -> (i32, i32, i32) {
    %c0_i32 = arith.constant 0 : i32
    %c0_i32_0 = arith.constant 0 : i32
    %c0_i32_1 = arith.constant 0 : i32
    return %arg0, %c0_i32, %c0_i32_0 : i32, i32, i32
  }
  func.func @transform_3(%arg0: i32) -> (i32, i32, i32) {
    %c0_i32 = arith.constant 0 : i32
    %c0_i32_0 = arith.constant 0 : i32
    %c0_i32_1 = arith.constant 0 : i32
    return %arg0, %c0_i32, %c0_i32_0 : i32, i32, i32
  }
}

</mosaic_0001>

<bundles_post_ra>
// kernel: tpu_custom_call.1
= control target key start
LH: loop header
LB: loop body
LE: loop exit
PB: predicated region body
PF: predicated region fallthrough
CT: control target
= control target key end

     0   :  { %9 = vsyncpa [#allocation3], 0  ;;  %s1259_s0 = inlined_call_operand.hbm [shape: bf16[24,256], index: 0, kind: input, shape index: {}]   ;;  %s1260_s1 = inlined_call_operand.hbm [shape: bf16[256,256], index: 1, kind: input, shape index: {}]   ;;  %s1261_s2 = inlined_call_operand.hbm [shape: f32[3,1,256], index: 2, kind: output, shape index: {0}]   ;;  %s1262_s3 = inlined_call_operand.hbm [shape: f32[3,1,256], index: 3, kind: output, shape index: {1}]  }
   0x1   :  { %11 = vsyncpa [#allocation3 + $0x1], 0 }
   0x2   :  { %12 = vsyncpa [#allocation6], 0 }
   0x3   :  { %13 = vsyncpa [#allocation4], 0 }
   0x4   :  { %15 = vsyncpa [#allocation4 + $0x1], 0 }
   0x5   :  { %16 = vsyncpa [#allocation9], 0 }
   0x6   :  { %18 = vsyncpa [#allocation9 + $0x1], 0  ;;  %s1090_s12 = smov 0   ;;  %s1092_s13 = smov 0  }
   0x7   :  { %s1094_s14 = smov 0   ;;  %s1096_s15 = smov 0  }
   0x8 LB: > { %s139_s18 = sshll.u32 %s1260_s1, 4  ;;  %s1114_s19 = sadd.s32 4294967295, %s1065_s15   ;;  %s1065_s15 = sphi %s1096_s15, %s1273_s15   ;;  %s1061_s14 = sphi %s1094_s14, %s1272_s14   ;;  %s1057_s13 = sphi %s1092_s13, %s1271_s13   ;;  %s1053_s12 = sphi %s1090_s12, %s1270_s12   ;;  %s140_s18 = int_to_ptr.hbm [resolvable:$true] %s139_s18 }
   0x9   : > { %p661_p0 = scmp.ge.s32.totalorder %s1065_s15, 1  ;;  %p45_p1 = scmp.eq.s32.totalorder %s1114_s19, 0 }
   0xa   : > { %p128_p2 = scmp.lt.s32.totalorder %s1065_s15, 4  ;;  %s1067_s21 = smov [#allocation5]  }
   0xb   : > { %s141_s22 = sshll.u32 %s1067_s21, 4  ;;  %s1068_s23 = smov 128   ;;  %s142_s22 = int_to_ptr.vmem [resolvable:$true] %s141_s22 }
   0xc   : > { %p1119_p3 = pnand %p661_p0, %p128_p2  ;;  %s1069_s24 = smov 8  }
   0xd   : > { %s660_s25 = sadd.s32 4294967294, %s1065_s15   ;;  %s1129_s26 = sadd.s32 1, %s1065_s15  }
   0xe   : > { %p849_p4 = pneg %p1119_p3  ;;  %s31_s27 = sadd.s32 1, %s1061_s14 }
   0xf   : > { %s28_s28 = ssub.s32 %s1065_s15, %s1129_s26  ;;  %p38_p6 = scmp.ne.s32.totalorder %s1061_s14, %s1057_s13 }
  0x10   : > { %p850_p5 = pnand %p849_p4, %p45_p1  ;;  %p29_p7 = scmp.eq.s32.totalorder %s28_s28, 0 }
  0x11   : > { %p39_p8 = scmp.eq.s32.totalorder %s1065_s15, 0  ;;  %p44_p9 = scmp.ne.s32.totalorder %s1057_s13, %s1053_s12 }
  0x12   : > { %852 = dma.hbm_to_vmem [thread:$0]  (!%p850_p5), %s140_s18, 4096, %s142_s22, [#allocation6], %s1068_s23, %s1068_s23, %s1069_s24  }
  0x13   : > { %p89_p10 = scmp.eq.s32.totalorder %s1114_s19, 2  ;;  %p1145_p11 = por %p45_p1, %p44_p9 }
  0x14   : > { %s1141_s29 = scalar_select %p29_p7, %s1061_s14, %s31_s27  }
  0x15   : > { %p1149_p12 = por %p89_p10, %p38_p6  ;;  %p95_p13 = scmp.eq.s32.totalorder %s660_s25, 2 }
  0x16   : > { %p40_p0 = por %p39_p8, %p38_p6  ;;  %s155_s5 = sand.u32 1, %s1061_s14  }
  0x17   : > { %p1154_p2 = por %p95_p13, %p44_p9  ;;  %p865_p4 = scmp.lt.s32.totalorder %s1065_s15, 3 }
  0x18   : > { %s664_s7 = sshll.u32 %s155_s5, 3  ;;  %s806_s8 = sshll.u32 %s1065_s15, 3 }
  0x19   : > { %s164_s11 = scalar_lea.hbm %s1259_s0, %s806_s8  ;;  %s159_s17 = scalar_lea.vmem [#allocation2], %s664_s7 }
  0x1a   : > { %s166_s16 = sshll.u32 %s164_s11, 4  ;;  %s168_s18 = sshll.u32 %s159_s17, 4  ;;  %s167_s16 = int_to_ptr.hbm [resolvable:$true] %s166_s16  ;;  %s169_s18 = int_to_ptr.vmem [resolvable:$true] %s168_s18 }
  0x1b   : > { %p1163_p5 = pnand %p865_p4, %p40_p0  ;;  %s156_s22 = scalar_lea.sflag [#allocation3], %s155_s5 }
  0x1c   : > { %s933_s23 = sshra.s32 %s167_s16, 4  ;;  %s940_s28 = scalar_lea.hbm %s1259_s0, 24  ;;  %s934_s23 = int_to_ptr.hbm [resolvable:$true] %s933_s23 }
  0x1d   : > { %s935_s24 = scalar_lea.hbm %s934_s23, 8  ;;  %p937_p7 = pneg %p1163_p5 }
  0x1e   : > { %p936_p6 = scmp.ne.s32.totalorder %s934_s23, %s935_s24  ;;  %p941_p10 = scmp.lt.s32.totalorder %s934_s23, %s1259_s0 }
  0x1f   : > { %p942_p13 = scmp.lt.s32.totalorder %s940_s28, %s935_s24 }
  0x20   : > { %p938_p8 = pnand %p937_p7, %p936_p6 }
  0x21   : > { %p943_p0 = por %p942_p13, %p941_p10 }
  0x22   : > { %p939_p9 = pneg %p938_p8 }
  0x24   : > { %p944_p4 = pnand %p943_p0, %p939_p9 }
  0x26   : > { %947 = shalt.err (!%p944_p4)
}
  0x27   : > { %856 = dma.hbm_to_vmem [thread:$0]  (!%p1163_p5), %s167_s16, 128, %s169_s18, %s156_s22  }
  0x28   : > { %177 = sbr.rel (%p1119_p3) target bundleno = 249 (0xf9), region = 28  ;;  %s1180_s5 = sand.u32 (!%p1119_p3), 1, %s1057_s13  }
  0x29   : > { %s668_s9 = sshll.u32 (!%p1119_p3), %s1180_s5, 3  ;;  %s180_s10 = scalar_lea.sflag (!%p1119_p3), [#allocation3], %s1180_s5 }
  0x2a   : > { %s1184_s11 = scalar_lea.vmem (!%p1119_p3), [#allocation2], %s668_s9 }
  0x2d   : > { %1036 = dma.done.wait (%p1145_p11), %s180_s10, 128  }
  0x2e   : > { %1038 = vsyncadd (%p1145_p11), %s180_s10, 4294967168 }
  0x2f   : > { %1040 = dma.done.wait (%p45_p1), [#allocation6], 4096  }
  0x30   : > { %1042 = vsyncadd (%p45_p1), [#allocation6], 4294963200  ;;  %v730_v0 = vld [vmem:[#allocation5 + $0x70] sm:$0xf]  ;;  %v822_v1 = vld [vmem:[#allocation5 + $0x74] sm:$0xf0] }
  0x31   : > { %v794_v2 = vld [vmem:[#allocation5 + $0xf0] sm:$0xf]  ;;  %v731_v3 = vor.u32 %v822_v1, %v730_v0  ;;  %v838_v4 = vld [vmem:[#allocation5 + $0xf4] sm:$0xf0]  ;;  %v821_v5 = vld [vmem:[#allocation5 + $0x74] sm:$0xf] }
  0x32   : > { %v732_v6 = vld [vmem:[#allocation5 + $0x78] sm:$0xf0]  ;;  %v795_v7 = vor.u32 %v838_v4, %v794_v2  ;;  %v837_v9 = vld [vmem:[#allocation5 + $0xf4] sm:$0xf]  ;;  %v722_v11 = vld [vmem:[#allocation5 + $0x60] sm:$0xf] }
  0x33   : > { %v735_v8 = vor.u32 %v821_v5, %v732_v6  ;;  %v796_v10 = vld [vmem:[#allocation5 + $0xf8] sm:$0xf0]  ;;  %417 = vmatpush.bf16.msra.mxu0 %v731_v3  ;;  %v820_v13 = vld [vmem:[#allocation5 + $0x64] sm:$0xf0]  ;;  %v786_v14 = vld [vmem:[#allocation5 + $0xe0] sm:$0xf] }
  0x34   : > { %v799_v12 = vor.u32 %v837_v9, %v796_v10  ;;  %v836_v15 = vld [vmem:[#allocation5 + $0xe4] sm:$0xf0]  ;;  %430 = vmatpush.bf16.msra.mxu1 %v795_v7  ;;  %v723_v16 = vor.u32 %v820_v13, %v722_v11  ;;  %v819_v18 = vld [vmem:[#allocation5 + $0x64] sm:$0xf]  ;;  %v724_v19 = vld [vmem:[#allocation5 + $0x68] sm:$0xf0] }
  0x35   : > { %443 = vmatpush.bf16.msra.mxu2 %v735_v8  ;;  %v787_v17 = vor.u32 %v836_v15, %v786_v14  ;;  %v835_v20 = vld [vmem:[#allocation5 + $0xe4] sm:$0xf]  ;;  %v727_v21 = vor.u32 %v819_v18, %v724_v19  ;;  %v788_v22 = vld [vmem:[#allocation5 + $0xe8] sm:$0xf0]  ;;  %v714_v23 = vld [vmem:[#allocation5 + $0x50] sm:$0xf] }
  0x36   : > { %456 = vmatpush.bf16.msra.mxu3 %v799_v12  ;;  %v818_v24 = vld [vmem:[#allocation5 + $0x54] sm:$0xf0]  ;;  %v791_v25 = vor.u32 %v835_v20, %v788_v22  ;;  %v778_v26 = vld [vmem:[#allocation5 + $0xd0] sm:$0xf]  ;;  %v817_v28 = vld [vmem:[#allocation5 + $0x54] sm:$0xf] }
  0x37   : > { %v834_v27 = vld [vmem:[#allocation5 + $0xd4] sm:$0xf0]  ;;  %418 = vmatpush.bf16.msra.mxu0 %v723_v16  ;;  %v715_v29 = vor.u32 %v818_v24, %v714_v23  ;;  %v716_v30 = vld [vmem:[#allocation5 + $0x58] sm:$0xf0]  ;;  %v833_v31 = vld [vmem:[#allocation5 + $0xd4] sm:$0xf] }
  0x38   : > { %v780_v32 = vld [vmem:[#allocation5 + $0xd8] sm:$0xf0]  ;;  %431 = vmatpush.bf16.msra.mxu1 %v787_v17  ;;  %v779_v33 = vor.u32 %v834_v27, %v778_v26  ;;  %v719_v34 = vor.u32 %v817_v28, %v716_v30  ;;  %v706_v35 = vld [vmem:[#allocation5 + $0x40] sm:$0xf]  ;;  %v816_v36 = vld [vmem:[#allocation5 + $0x44] sm:$0xf0] }
  0x39   : > { %444 = vmatpush.bf16.msra.mxu2 %v727_v21  ;;  %v770_v37 = vld [vmem:[#allocation5 + $0xc0] sm:$0xf]  ;;  %v783_v38 = vor.u32 %v833_v31, %v780_v32  ;;  %v832_v39 = vld [vmem:[#allocation5 + $0xc4] sm:$0xf0]  ;;  %v815_v40 = vld [vmem:[#allocation5 + $0x44] sm:$0xf]  ;;  %v707_v44 = vor.u32 %v816_v36, %v706_v35 }
  0x3a   : > { %457 = vmatpush.bf16.msra.mxu3 %v791_v25  ;;  %v708_v41 = vld [vmem:[#allocation5 + $0x48] sm:$0xf0]  ;;  %v831_v42 = vld [vmem:[#allocation5 + $0xc4] sm:$0xf]  ;;  %v771_v45 = vor.u32 %v832_v39, %v770_v37  ;;  %v698_v47 = vld [vmem:[#allocation5 + $0x30] sm:$0xf] }
  0x3b   : > { %v772_v43 = vld [vmem:[#allocation5 + $0xc8] sm:$0xf0]  ;;  %419 = vmatpush.bf16.msra.mxu0 %v715_v29  ;;  %v711_v46 = vor.u32 %v815_v40, %v708_v41  ;;  %v814_v48 = vld [vmem:[#allocation5 + $0x34] sm:$0xf0]  ;;  %v762_v49 = vld [vmem:[#allocation5 + $0xb0] sm:$0xf] }
  0x3c   : > { %432 = vmatpush.bf16.msra.mxu1 %v779_v33  ;;  %v775_v50 = vor.u32 %v831_v42, %v772_v43  ;;  %v830_v51 = vld [vmem:[#allocation5 + $0xb4] sm:$0xf0]  ;;  %v813_v52 = vld [vmem:[#allocation5 + $0x34] sm:$0xf]  ;;  %v700_v53 = vld [vmem:[#allocation5 + $0x38] sm:$0xf0]  ;;  %v699_v56 = vor.u32 %v814_v48, %v698_v47 }
  0x3d   : > { %445 = vmatpush.bf16.msra.mxu2 %v719_v34  ;;  %v829_v54 = vld [vmem:[#allocation5 + $0xb4] sm:$0xf]  ;;  %v764_v55 = vld [vmem:[#allocation5 + $0xb8] sm:$0xf0]  ;;  %v763_v57 = vor.u32 %v830_v51, %v762_v49  ;;  %v703_v58 = vor.u32 %v813_v52, %v700_v53  ;;  %v690_v59 = vld [vmem:[#allocation5 + $0x20] sm:$0xf] }
  0x3e   : > { %458 = vmatpush.bf16.msra.mxu3 %v783_v38  ;;  %v812_v60 = vld [vmem:[#allocation5 + $0x24] sm:$0xf0]  ;;  %v754_v61 = vld [vmem:[#allocation5 + $0xa0] sm:$0xf]  ;;  %v767_v62 = vor.u32 %v829_v54, %v764_v55  ;;  %v811_v0 = vld [vmem:[#allocation5 + $0x24] sm:$0xf] }
  0x3f   : > { %420 = vmatpush.bf16.msra.mxu0 %v707_v44  ;;  %v828_v63 = vld [vmem:[#allocation5 + $0xa4] sm:$0xf0]  ;;  %v692_v1 = vld [vmem:[#allocation5 + $0x28] sm:$0xf0]  ;;  %v827_v2 = vld [vmem:[#allocation5 + $0xa4] sm:$0xf]  ;;  %v691_v4 = vor.u32 %v812_v60, %v690_v59 }
  0x40   : > { %433 = vmatpush.bf16.msra.mxu1 %v771_v45  ;;  %v756_v3 = vld [vmem:[#allocation5 + $0xa8] sm:$0xf0]  ;;  %v755_v5 = vor.u32 %v828_v63, %v754_v61  ;;  %v695_v6 = vor.u32 %v811_v0, %v692_v1  ;;  %v682_v7 = vld [vmem:[#allocation5 + $0x10] sm:$0xf]  ;;  %v810_v8 = vld [vmem:[#allocation5 + $0x14] sm:$0xf0] }
  0x41   : > { %446 = vmatpush.bf16.msra.mxu2 %v711_v46  ;;  %v746_v9 = vld [vmem:[#allocation5 + $0x90] sm:$0xf]  ;;  %v759_v10 = vor.u32 %v827_v2, %v756_v3  ;;  %v826_v11 = vld [vmem:[#allocation5 + $0x94] sm:$0xf0]  ;;  %v809_v12 = vld [vmem:[#allocation5 + $0x14] sm:$0xf]  ;;  %v683_v16 = vor.u32 %v810_v8, %v682_v7  ;;  %v487_v3 = vlaneseq }
  0x42   : > { %459 = vmatpush.bf16.msra.mxu3 %v775_v50  ;;  %v684_v13 = vld [vmem:[#allocation5 + $0x18] sm:$0xf0]  ;;  %v825_v14 = vld [vmem:[#allocation5 + $0x94] sm:$0xf]  ;;  %v747_v18 = vor.u32 %v826_v11, %v746_v9  ;;  %v674_v20 = vld [vmem:[#allocation5] sm:$0xf] }
  0x43   : > { %421 = vmatpush.bf16.msra.mxu0 %v699_v56  ;;  %v748_v15 = vld [vmem:[#allocation5 + $0x98] sm:$0xf0]  ;;  %v687_v19 = vor.u32 %v809_v12, %v684_v13  ;;  %v808_v21 = vld [vmem:[#allocation5 + $0x4] sm:$0xf0]  ;;  %v738_v22 = vld [vmem:[#allocation5 + $0x80] sm:$0xf] }
  0x44   : > { %434 = vmatpush.bf16.msra.mxu1 %v763_v57  ;;  %v217_v17 = vld [vmem:[%s1184_s11] sm:$0xff]  ;;  %v751_v23 = vor.u32 %v825_v14, %v748_v15  ;;  %v824_v24 = vld [vmem:[#allocation5 + $0x84] sm:$0xf0]  ;;  %v807_v25 = vld [vmem:[#allocation5 + $0x4] sm:$0xf]  ;;  %v675_v30 = vor.u32 %v808_v21, %v674_v20  ;;  %s670_s20 = sshll.u32 %s1180_s5, 1 }
  0x45   : > { %447 = vmatpush.bf16.msra.mxu2 %v703_v58  ;;  %v676_v26 = vld [vmem:[#allocation5 + $0x8] sm:$0xf0]  ;;  %v823_v27 = vld [vmem:[#allocation5 + $0x84] sm:$0xf]  ;;  %v251_v29 = vunpack.c.l.b16 %v217_v17  ;;  %v252_v31 = vunpack.c.h.b16 %v217_v17  ;;  %v739_v32 = vor.u32 %v824_v24, %v738_v22  ;;  %s802_s30 = sshll.u32 %s1114_s19, 1  ;;  %s209_s19 = scalar_lea.vmem [#allocation7], %s670_s20 }
  0x46   : > { %460 = vmatpush.bf16.msra.mxu3 %v767_v62  ;;  %v740_v28 = vld [vmem:[#allocation5 + $0x88] sm:$0xf0]  ;;  %v679_v33 = vor.u32 %v807_v25, %v676_v26  ;;  %s528_s18 = scalar_lea.hbm %s1261_s2, %s802_s30  ;;  %s542_s23 = scalar_lea.hbm %s1262_s3, %s802_s30  ;;  %vm484_vm0 = vcmask 1040384   ;;  %vm1203_vm1 = vcmp.lt.s32.totalorder %v487_v3, 256 }
  0x47   : > { %422 = vmatpush.bf16.msra.mxu0 %v691_v4  ;;  %v743_v34 = vor.u32 %v823_v27, %v740_v28  ;;  %v253_v35 = vpack.c.b16 %v251_v29, %v251_v29  ;;  %v254_v36 = vpack.c.b16 %v252_v31, %v252_v31  ;;  %s530_s24 = sshll.u32 %s209_s19, 4  ;;  %s532_s25 = sshll.u32 %s528_s18, 4  ;;  %s531_s24 = int_to_ptr.vmem [resolvable:$true] %s530_s24  ;;  %s533_s25 = int_to_ptr.hbm [resolvable:$true] %s532_s25 }
  0x48   : > { %435 = vmatpush.bf16.msra.mxu1 %v755_v5  ;;  %s216_s27 = scalar_lea.vmem [#allocation8], %s670_s20  ;;  %s546_s7 = sshll.u32 %s542_s23, 4  ;;  %s1212_s7 = int_to_ptr.hbm [resolvable:$true] %s546_s7 }
  0x49   : > { %448 = vmatpush.bf16.msra.mxu2 %v695_v6  ;;  %s544_s28 = sshll.u32 %s216_s27, 4  ;;  %s513_s8 = scalar_lea.sflag [#allocation4], %s1180_s5  ;;  %s1210_s28 = int_to_ptr.vmem [resolvable:$true] %s544_s28 }
  0x4a   : > { %461 = vmatpush.bf16.msra.mxu3 %v759_v10  ;;  %s977_s9 = sshra.s32 %s533_s25, 4  ;;  %s983_s30 = scalar_lea.hbm %s1261_s2, 6  ;;  %s978_s9 = int_to_ptr.hbm [resolvable:$true] %s977_s9 }
  0x4b   : > { %423 = vmatpush.bf16.msra.mxu0 %v683_v16  ;;  %s979_s10 = scalar_lea.hbm %s978_s9, 2  ;;  %p984_p5 = scmp.lt.s32.totalorder %s978_s9, %s1261_s2 }
  0x4c   : > { %436 = vmatpush.bf16.msra.mxu1 %v747_v18  ;;  %p980_p1 = scmp.ne.s32.totalorder %s978_s9, %s979_s10  ;;  %p985_p6 = scmp.lt.s32.totalorder %s983_s30, %s979_s10 }
  0x4d   : > { %449 = vmatpush.bf16.msra.mxu2 %v687_v19 }
  0x4e   : > { %462 = vmatpush.bf16.msra.mxu3 %v751_v23  ;;  %p981_p3 = pnand %p980_p1, %p1149_p12  ;;  %p986_p7 = por %p985_p6, %p984_p5 }
  0x4f   : > { %424 = vmatpush.bf16.msra.mxu0 %v675_v30 }
  0x50   : > { %437 = vmatpush.bf16.msra.mxu1 %v739_v32  ;;  %p982_p11 = pneg %p981_p3 }
  0x51   : > { %450 = vmatpush.bf16.msra.mxu2 %v679_v33 }
  0x52   : > { %463 = vmatpush.bf16.msra.mxu3 %v743_v34  ;;  %425 = vmatmul.bf16.vlgmr.msra.gmra.mxu0 %v253_v35  ;;  %p987_p8 = pnand %p986_p7, %p982_p11 }
  0x53   : > { %438 = vmatmul.bf16.vlgmr.msra.gmra.mxu1 %v254_v36 }
  0x54   : > { %451 = vmatmul.bf16.vlgmr.msra.gmra.mxu2 %v253_v35 }
  0x55   : > { %464 = vmatmul.bf16.vlgmr.msra.gmra.mxu3 %v254_v36 }
  0xcf   : > { %v426_v37 = vpop.f32.mrf.mxu0 }
  0xd0   : > { %v439_v38 = vpop.f32.mrf.mxu1 }
  0xd1   : > { %v440_v39 = vadd.f32 %v439_v38, %v426_v37 }
  0xd3   : > { %v469_v40 = vrot.slane %v440_v39, 4  ;;  %v492_v41 = vmul.f32 %v440_v39, %v440_v39 }
  0xd5   : > { %v494_v42 = vrot.slane %v492_v41, 4  ;;  %v470_v43 = vadd.f32 %v469_v40, %v440_v39 }
  0xd7   : > { %v452_v44 = vpop.f32.mrf.mxu2  ;;  %v428_v46 = vpop.f32.mrf.mxu0  ;;  %v495_v47 = vadd.f32 %v494_v42, %v492_v41  ;;  %v471_v50 = vrot.slane %v470_v43, 2 }
  0xd8   : > { %v465_v45 = vpop.f32.mrf.mxu3  ;;  %v441_v49 = vpop.f32.mrf.mxu1 }
  0xd9   : > { %v466_v48 = vadd.f32 %v465_v45, %v452_v44  ;;  %v496_v53 = vrot.slane %v495_v47, 2  ;;  %v472_v56 = vadd.f32 %v471_v50, %v470_v43 }
  0xdb   : > { %v475_v51 = vrot.slane %v466_v48, 4  ;;  %v493_v52 = vmul.f32 %v466_v48, %v466_v48  ;;  %v497_v61 = vadd.f32 %v496_v53, %v495_v47  ;;  %v473_v0 = vrot.slane %v472_v56, 1 }
  0xdd   : > { %v476_v54 = vadd.f32 %v475_v51, %v466_v48  ;;  %v500_v55 = vrot.slane %v493_v52, 4  ;;  %v498_v4 = vrot.slane %v497_v61, 1  ;;  %v474_v7 = vadd.f32 %v473_v0, %v472_v56 }
  0xdf   : > { %v477_v57 = vrot.slane %v476_v54, 2  ;;  %v501_v58 = vadd.f32 %v500_v55, %v493_v52  ;;  %v454_v59 = vpop.f32.mrf.mxu2  ;;  %v499_v11 = vadd.f32 %v498_v4, %v497_v61 }
  0xe0   : > { %v467_v60 = vpop.f32.mrf.mxu3 }
  0xe1   : > { %v478_v62 = vadd.f32 %v477_v57, %v476_v54  ;;  %v502_v63 = vrot.slane %v501_v58, 2 }
  0xe3   : > { %v479_v1 = vrot.slane %v478_v62, 1  ;;  %v503_v2 = vadd.f32 %v502_v63, %v501_v58 }
  0xe5   : > { %v480_v5 = vadd.f32 %v479_v1, %v478_v62  ;;  %v504_v6 = vrot.slane %v503_v2, 1 }
  0xe7   : > { %v483_v8 = vrot.slane %v480_v5, 7  ;;  %v505_v9 = vadd.f32 %v504_v6, %v503_v2 }
  0xe9   : > { %v508_v12 = vrot.slane %v505_v9, 7  ;;  %v485_v13 = vsel %vm484_vm0, %v474_v7, %v483_v8 }
  0xea   : > { %491 = vst.msk [vmem:[%s209_s19] sm:$0x3] %vm1203_vm1, %v485_v13 }
  0xeb   : > { %990 = shalt.err (!%p987_p8)
}
  0xec   : > { %845 = dma.vmem_to_hbm [thread:$0]  (%p1149_p12), %s531_s24, 32, %s533_s25, %s513_s8   ;;  %v509_v14 = vsel %vm484_vm0, %v499_v11, %v508_v12 }
  0xed   : > { %511 = vst.msk [vmem:[%s216_s27] sm:$0x3] %vm1203_vm1, %v509_v14  ;;  %s518_s18 = scalar_lea.sflag [#allocation9], %s1180_s5  ;;  %s1005_s21 = sshra.s32 %s1212_s7, 4  ;;  %s1006_s21 = int_to_ptr.hbm [resolvable:$true] %s1005_s21 }
  0xee   : > { %s1007_s22 = scalar_lea.hbm %s1006_s21, 2  ;;  %s1011_s9 = scalar_lea.hbm %s1262_s3, 6 }
  0xef   : > { %p1008_p9 = scmp.ne.s32.totalorder %s1006_s21, %s1007_s22  ;;  %p1012_p0 = scmp.lt.s32.totalorder %s1006_s21, %s1262_s3 }
  0xf0   : > { %p1013_p4 = scmp.lt.s32.totalorder %s1011_s9, %s1007_s22 }
  0xf1   : > { %p1009_p10 = pnand %p1008_p9, %p1149_p12 }
  0xf2   : > { %p1014_p1 = por %p1013_p4, %p1012_p0 }
  0xf3   : > { %p1010_p13 = pneg %p1009_p10 }
  0xf5   : > { %p1015_p3 = pnand %p1014_p1, %p1010_p13 }
  0xf7   : > { %1018 = shalt.err (!%p1015_p3)
}
  0xf8   : > { %846 = dma.vmem_to_hbm [thread:$0]  (%p1149_p12), %s1210_s28, 32, %s1212_s7, %s518_s18  }
  0xf9 PF: > { %p867_p11 = scmp.ge.s32.totalorder %s1065_s15, 2  ;;  %s558_s5 = sand.u32 1, %s1053_s12  }
  0xfa   : > { %s559_s24 = scalar_lea.sflag [#allocation4], %s558_s5 }
  0xfb   : > { %p858_p5 = pnand %p867_p11, %p1154_p2 }
  0xfd   : > { %p859_p6 = pneg %p858_p5 }
  0xff   : > { %1044 = dma.done.wait (%p859_p6), %s559_s24, 32  }
 0x100   : > { %1046 = vsyncadd (%p859_p6), %s559_s24, 4294967264  ;;  %s569_s25 = scalar_lea.sflag [#allocation9], %s558_s5 }
 0x101   : > { %1048 = dma.done.wait (%p859_p6), %s569_s25, 32  }
 0x102   : > { %1050 = vsyncadd (%p859_p6), %s569_s25, 4294967264  ;;  %p21_p12 = scmp.ge.s32.totalorder %s1129_s26, 5   ;;  %s1270_s12 = smov %s1057_s13 }
 0x103   : > { %s1271_s13 = smov %s1061_s14  ;;  %s1272_s14 = smov %s1141_s29 }
 0x104   : > { %s1273_s15 = smov %s1129_s26  ;;  %23 = sbr.rel (!%p21_p12) target bundleno = 8 (0x8), region = 94 }
 0x109   :  { %575 = vsyncpa [#allocation3], 1 }
 0x10a   :  { %577 = vsyncpa [#allocation3 + $0x1], 1 }
 0x10b   :  { %578 = vsyncpa [#allocation6], 1 }
 0x10c   :  { %579 = vsyncpa [#allocation4], 1 }
 0x10d   :  { %581 = vsyncpa [#allocation4 + $0x1], 1 }
 0x10e   :  { %582 = vsyncpa [#allocation9], 1 }
 0x10f   :  { %584 = vsyncpa [#allocation9 + $0x1], 1 }

</bundles_post_ra>
